<compile_context>
chip_gen: v6e
topology: v6e:2x2x1
jax: 0.10.0
libtpu: 0.0.40
codegen_flags: <defaults>
</compile_context>

<pallas_src>
import jax
import jax.numpy as jnp
import numpy as np
from jax.experimental import pallas as pl
from jax.experimental.pallas import tpu as pltpu


# --------------------------------------------------------------------------------------
# Fused BN + ReLU + (horizontal-pool ⊗ 1x1 conv) matmul + vertical-pool kernel
# --------------------------------------------------------------------------------------
def _transition_kernel(x_ref, w_ref, scale_ref, bias_ref, o_ref):
    # x_ref:      (1, 2*TH, Wp, 2*Cin) f32  -- adjacent W pixels pre-folded into channels
    # w_ref:      (2*Cin, Cout)        bf16 -- 0.25 * [w; w]  (horizontal pool + 1x1 conv)
    # scale_ref:  (1, 2*Cin)           f32  -- folded eval-mode BatchNorm scale
    # bias_ref:   (1, 2*Cin)           f32  -- folded eval-mode BatchNorm bias
    # o_ref:      (1, TH, Wp, Cout)    f32
    _, th, wp, cout = o_ref.shape
    c2 = x_ref.shape[-1]

    x = x_ref[...]
    z = jnp.maximum(x * scale_ref[...] + bias_ref[...], 0.0)        # BN (folded) + ReLU, VPU f32
    z = z.reshape(th, 2, wp, c2)                                     # split H rows (outer dims only)
    zh = z[:, 0] + z[:, 1]                                           # vertical pool (sum of row pair)
    lhs = zh.reshape(th * wp, c2).astype(jnp.bfloat16)               # (M, K), K = 2*Cin, bf16 operand
    y = jnp.dot(lhs, w_ref[...], preferred_element_type=jnp.float32)  # single long-K MXU matmul
    o_ref[...] = y.reshape(1, th, wp, cout)


def _pick_row_tile(hp, wp, c2, budget_bytes=2 << 20):
    """Largest pooled-row tile dividing hp whose f32 input block stays under the budget."""
    for th in range(hp, 0, -1):
        if hp % th == 0 and 2 * th * wp * c2 * 4 <= budget_bytes:
            return th
    return 1


def transition_layer(x_nchw, params):
    """Forward of TransitionLayer: BN -> ReLU -> Conv1x1(no bias) -> AvgPool2d(2,2).

    x_nchw: (N, Cin, H, W) float32, PyTorch layout.  Returns (N, Cout, H//2, W//2).
    """
    w2, scale2, bias2 = params["w2"], params["scale2"], params["bias2"]

    # layout: PyTorch NCHW -> NHWC so channels sit on the TPU lane dimension
    x = jnp.transpose(x_nchw, (0, 2, 3, 1)).astype(jnp.float32)
    N, H, W, Cin = x.shape
    assert H % 2 == 0 and W % 2 == 0, "AvgPool2d(2, stride=2) needs even spatial dims"
    Hp, Wp = H // 2, W // 2
    C2 = 2 * Cin
    Cout = w2.shape[-1]

    # Fold adjacent W pixels into the channel (lane) axis OUTSIDE the kernel: contiguous
    # row-major reshape, so the kernel only needs leading-dim reshapes internally.
    x2 = x.reshape(N, H, Wp, C2)

    th = _pick_row_tile(Hp, Wp, C2)
    grid = (N, Hp // th)

    # VMEM sizing from actual block bytes (double-buffered), capped below v7x's 64 MiB.
    blk_bytes = (
        2 * (2 * th * Wp * C2 * 4)        # input block, f32, double-buffered
        + 2 * (C2 * Cout * 2)             # weight block, bf16, double-buffered (constant index)
        + 4 * (C2 * 4)                    # scale + bias
        + 2 * (th * Wp * Cout * 4)        # output block, f32, double-buffered
    )
    vmem_limit = int(min(max(2 * blk_bytes, 8 << 20), 48 << 20))

    out_nhwc = pl.pallas_call(
        _transition_kernel,
        out_shape=jax.ShapeDtypeStruct((N, Hp, Wp, Cout), jnp.float32),
        grid=grid,
        in_specs=[
            pl.BlockSpec((1, 2 * th, Wp, C2), lambda n, i: (n, i, 0, 0)),
            pl.BlockSpec((C2, Cout), lambda n, i: (0, 0)),
            pl.BlockSpec((1, C2), lambda n, i: (0, 0)),
            pl.BlockSpec((1, C2), lambda n, i: (0, 0)),
        ],
        out_specs=pl.BlockSpec((1, th, Wp, Cout), lambda n, i: (n, i, 0, 0)),
        compiler_params=pltpu.CompilerParams(
            dimension_semantics=("parallel", "parallel"),
            vmem_limit_bytes=vmem_limit,
        ),
    )(x2, w2, scale2, bias2)

    return jnp.transpose(out_nhwc, (0, 3, 1, 2))  # NHWC -> NCHW


# --------------------------------------------------------------------------------------
# Parameter construction (deterministic, synthetic; BN folded for eval mode)
# --------------------------------------------------------------------------------------
def init_params(key, in_channels, reduction):
    out_channels = int(in_channels * reduction)
    kg, kb, km, kv, kw = jax.random.split(key, 5)

    gamma = 1.0 + 0.1 * jax.random.normal(kg, (in_channels,), jnp.float32)
    beta = 0.1 * jax.random.normal(kb, (in_channels,), jnp.float32)
    running_mean = 0.1 * jax.random.normal(km, (in_channels,), jnp.float32)
    running_var = jnp.abs(1.0 + 0.1 * jax.random.normal(kv, (in_channels,), jnp.float32))
    eps = 1e-5

    # PyTorch Conv2d(1x1, bias=False) weight (Cout, Cin, 1, 1) -> (Cin, Cout) for NHWC matmul
    w_pt = jax.random.normal(kw, (out_channels, in_channels), jnp.float32) / np.sqrt(in_channels)
    w = jnp.transpose(w_pt, (1, 0))                                   # (Cin, Cout) f32

    scale = gamma / jnp.sqrt(running_var + eps)                       # folded BN (eval)
    bias = beta - running_mean * scale

    # Kernel-side params: adjacent W pixels are folded into the channel axis, so duplicate
    # scale/bias along the pair axis and tile the weight over K; 0.25 = 2x2 avg-pool factor.
    scale2 = jnp.concatenate([scale, scale]).reshape(1, 2 * in_channels).astype(jnp.float32)
    bias2 = jnp.concatenate([bias, bias]).reshape(1, 2 * in_channels).astype(jnp.float32)
    w2 = (0.25 * jnp.concatenate([w, w], axis=0)).astype(jnp.bfloat16)  # (2*Cin, Cout) bf16

    # Plain-f32 copies kept only for the reference check.
    return {
        "w2": w2, "scale2": scale2, "bias2": bias2,
        "ref_w": w, "ref_scale": scale.reshape(1, in_channels), "ref_bias": bias.reshape(1, in_channels),
    }


def transition_layer_reference(x_nchw, params):
    """Plain-JAX reference: BN(eval, folded) -> ReLU -> 1x1 conv -> AvgPool2d(2,2)."""
    x = jnp.transpose(x_nchw, (0, 2, 3, 1)).astype(jnp.float32)
    z = jnp.maximum(x * params["ref_scale"] + params["ref_bias"], 0.0)
    y = jnp.einsum("nhwc,cd->nhwd", z, params["ref_w"])
    N, H, W, D = y.shape
    y = y.reshape(N, H // 2, 2, W // 2, 2, D).mean(axis=(2, 4))
    return jnp.transpose(y, (0, 3, 1, 2))


# --------------------------------------------------------------------------------------
if __name__ == "__main__":
    key = jax.random.PRNGKey(0)
    k_params, k_x = jax.random.split(key)

    # Small shapes consistent with the module: DenseNet-style transition with reduction=0.5.
    # in_channels=256 keeps both the folded K (=512) and Cout (=128) lane-dense on TPU.
    in_channels, reduction = 256, 0.5
    N, H, W = 2, 16, 16

    params = init_params(k_params, in_channels, reduction)
    x = jax.random.normal(k_x, (N, in_channels, H, W), jnp.float32)

    fwd = jax.jit(transition_layer)
    out = fwd(x, params)
    jax.block_until_ready(out)

    assert out.shape == (N, int(in_channels * reduction), H // 2, W // 2), out.shape

    # correctness vs plain-JAX reference (bf16 MXU operands -> loose tolerance)
    ref = jax.jit(transition_layer_reference)(x, params)
    np.testing.assert_allclose(np.asarray(out), np.asarray(ref), rtol=5e-2, atol=5e-2)

    print("KERNEL_OK")
</pallas_src>

<mosaic_0001>
module attributes {stable_mosaic.version = 11 : i64} {
  func.func @_transition_kernel(%arg0: i32, %arg1: i32, %arg2: memref<1x16x8x512xf32, #tpu.memory_space<vmem>>, %arg3: memref<512x128xbf16, #tpu.memory_space<vmem>>, %arg4: memref<1x512xf32, #tpu.memory_space<vmem>>, %arg5: memref<1x512xf32, #tpu.memory_space<vmem>>, %arg6: memref<1x8x8x128xf32, #tpu.memory_space<vmem>>) attributes {dimension_semantics = [#tpu.dimension_semantics<parallel>, #tpu.dimension_semantics<parallel>], iteration_bounds = array<i64: 2, 1>, scalar_prefetch = 0 : i64, scratch_operands = 0 : i64, tpu.core_type = #tpu.core_type<tc>, window_params = [{transform_indices = @transform_0, window_bounds = array<i64: 1, 16, 8, 512>}, {pipeline_mode = #tpu.pipeline_mode<synchronous>, transform_indices = @transform_1, window_bounds = array<i64: 512, 128>}, {pipeline_mode = #tpu.pipeline_mode<synchronous>, transform_indices = @transform_2, window_bounds = array<i64: 1, 512>}, {pipeline_mode = #tpu.pipeline_mode<synchronous>, transform_indices = @transform_3, window_bounds = array<i64: 1, 512>}, {transform_indices = @transform_4, window_bounds = array<i64: 1, 8, 8, 128>}]} {
    %c0 = arith.constant 0 : index
    %c0_0 = arith.constant 0 : index
    %c0_1 = arith.constant 0 : index
    %c0_2 = arith.constant 0 : index
    %0 = vector.load %arg2[%c0, %c0_0, %c0_1, %c0_2] : memref<1x16x8x512xf32, #tpu.memory_space<vmem>>, vector<1x16x8x512xf32>
    %c0_3 = arith.constant 0 : index
    %c0_4 = arith.constant 0 : index
    %1 = vector.load %arg4[%c0_3, %c0_4] : memref<1x512xf32, #tpu.memory_space<vmem>>, vector<1x512xf32>
    %2 = vector.shape_cast %1 : vector<1x512xf32> to vector<1x1x1x512xf32>
    %3 = vector.broadcast %2 : vector<1x1x1x512xf32> to vector<1x16x8x512xf32>
    %4 = arith.mulf %0, %3 : vector<1x16x8x512xf32>
    %c0_5 = arith.constant 0 : index
    %c0_6 = arith.constant 0 : index
    %5 = vector.load %arg5[%c0_5, %c0_6] : memref<1x512xf32, #tpu.memory_space<vmem>>, vector<1x512xf32>
    %6 = vector.shape_cast %5 : vector<1x512xf32> to vector<1x1x1x512xf32>
    %7 = vector.broadcast %6 : vector<1x1x1x512xf32> to vector<1x16x8x512xf32>
    %8 = arith.addf %4, %7 : vector<1x16x8x512xf32>
    %cst = arith.constant 0.000000e+00 : f32
    %9 = vector.broadcast %cst : f32 to vector<1x16x8x512xf32>
    %10 = arith.maximumf %8, %9 : vector<1x16x8x512xf32>
    %11 = vector.shape_cast %10 : vector<1x16x8x512xf32> to vector<8x2x8x512xf32>
    %12 = vector.extract_strided_slice %11 {offsets = [0, 0, 0, 0], sizes = [8, 1, 8, 512], strides = [1, 1, 1, 1]} : vector<8x2x8x512xf32> to vector<8x1x8x512xf32>
    %13 = vector.shape_cast %12 : vector<8x1x8x512xf32> to vector<8x8x512xf32>
    %14 = vector.extract_strided_slice %11 {offsets = [0, 1, 0, 0], sizes = [8, 1, 8, 512], strides = [1, 1, 1, 1]} : vector<8x2x8x512xf32> to vector<8x1x8x512xf32>
    %15 = vector.shape_cast %14 : vector<8x1x8x512xf32> to vector<8x8x512xf32>
    %16 = arith.addf %13, %15 : vector<8x8x512xf32>
    %17 = vector.shape_cast %16 : vector<8x8x512xf32> to vector<64x512xf32>
    %18 = arith.truncf %17 : vector<64x512xf32> to vector<64x512xbf16>
    %c0_7 = arith.constant 0 : index
    %c0_8 = arith.constant 0 : index
    %19 = vector.load %arg3[%c0_7, %c0_8] : memref<512x128xbf16, #tpu.memory_space<vmem>>, vector<512x128xbf16>
    %cst_9 = arith.constant dense<0.000000e+00> : vector<64x128xf32>
    %20 = tpu.matmul %18, %19, %cst_9 {dimension_numbers = #tpu.dot_dimension_numbers<[1], [0], [0], [1], [0, 0, 1, 1], [], []>} : vector<64x512xbf16>, vector<512x128xbf16>, vector<64x128xf32> -> vector<64x128xf32>
    %21 = vector.shape_cast %20 : vector<64x128xf32> to vector<1x8x8x128xf32>
    %c0_10 = arith.constant 0 : index
    %c0_11 = arith.constant 0 : index
    %c0_12 = arith.constant 0 : index
    %c0_13 = arith.constant 0 : index
    %22 = vector.load %arg6[%c0_10, %c0_11, %c0_12, %c0_13] : memref<1x8x8x128xf32, #tpu.memory_space<vmem>>, vector<1x8x8x128xf32>
    tpu.vector_store %arg6[%c0_10, %c0_11, %c0_12, %c0_13], %21 {strides = array<i32>} : memref<1x8x8x128xf32, #tpu.memory_space<vmem>>, vector<1x8x8x128xf32>,
    return
  }
  func.func @transform_0(%arg0: i32, %arg1: i32) -> (i32, i32, i32, i32) {
    %c0_i32 = arith.constant 0 : i32
    %c0_i32_0 = arith.constant 0 : i32
    %c0_i32_1 = arith.constant 0 : i32
    return %arg0, %arg1, %c0_i32, %c0_i32_0 : i32, i32, i32, i32
  }
  func.func @transform_1(%arg0: i32, %arg1: i32) -> (i32, i32) {
    %c0_i32 = arith.constant 0 : i32
    %c0_i32_0 = arith.constant 0 : i32
    %c0_i32_1 = arith.constant 0 : i32
    return %c0_i32, %c0_i32_0 : i32, i32
  }
  func.func @transform_2(%arg0: i32, %arg1: i32) -> (i32, i32) {
    %c0_i32 = arith.constant 0 : i32
    %c0_i32_0 = arith.constant 0 : i32
    %c0_i32_1 = arith.constant 0 : i32
    return %c0_i32, %c0_i32_0 : i32, i32
  }
  func.func @transform_3(%arg0: i32, %arg1: i32) -> (i32, i32) {
    %c0_i32 = arith.constant 0 : i32
    %c0_i32_0 = arith.constant 0 : i32
    %c0_i32_1 = arith.constant 0 : i32
    return %c0_i32, %c0_i32_0 : i32, i32
  }
  func.func @transform_4(%arg0: i32, %arg1: i32) -> (i32, i32, i32, i32) {
    %c0_i32 = arith.constant 0 : i32
    %c0_i32_0 = arith.constant 0 : i32
    %c0_i32_1 = arith.constant 0 : i32
    return %arg0, %arg1, %c0_i32, %c0_i32_0 : i32, i32, i32, i32
  }
}

</mosaic_0001>

<bundles_post_ra>
// kernel: transition_layer.1
= control target key start
LH: loop header
LB: loop body
LE: loop exit
PB: predicated region body
PF: predicated region fallthrough
CT: control target
= control target key end

     0   :  { %9 = vsyncpa [#allocation3], 0  ;;  %s1834_s0 = inlined_call_operand.vmem [shape: f32[2,16,8,512], index: 0, kind: input, shape index: {}]   ;;  %s1835_s1 = inlined_call_operand.vmem [shape: bf16[512,128], index: 1, kind: input, shape index: {}]   ;;  %s1836_s2 = inlined_call_operand.vmem [shape: f32[1,512], index: 2, kind: input, shape index: {}]   ;;  %s1837_s3 = inlined_call_operand.vmem [shape: f32[1,512], index: 3, kind: input, shape index: {}]   ;;  %s1838_s4 = inlined_call_operand.hbm [shape: f32[2,8,8,128], index: 4, kind: output, shape index: {}]  }
   0x1   :  { %11 = vsyncpa [#allocation3 + $0x1], 0  ;;  %s1393_s15 = smov 0   ;;  %s1395_s16 = smov 0  }
   0x2   :  { %s1397_s17 = smov 0   ;;  %s1399_s18 = smov 0  }
   0x3   :  { %s1401_s19 = smov 0   ;;  %s1403_s20 = smov 0  }
   0x4 LB: > { %s1071_s21 = sadd.s32 4294967295, %s1363_s20   ;;  %s1072_s22 = sadd.s32 4294967294, %s1363_s20   ;;  %s1363_s20 = sphi %s1403_s20, %s17_s20   ;;  %s1359_s19 = sphi %s1401_s19, %s1845_s19   ;;  %s1355_s18 = sphi %s1399_s18, %s1844_s18   ;;  %s1351_s17 = sphi %s1397_s17, %s1843_s17   ;;  %s1347_s16 = sphi %s1395_s16, %s1842_s16   ;;  %s1343_s15 = sphi %s1393_s15, %s1841_s15  }
   0x5   : > { %s29_s23 = sadd.s32 1, %s1359_s19  ;;  %s129_s24 = sadd.s32 1, %s1351_s17 }
   0x6   : > { %p31_p0 = scmp.ge.s32.totalorder %s29_s23, 2  ;;  %p139_p1 = scmp.ne.s32.totalorder %s1351_s17, %s1347_s16 }
   0x7   : > { %p140_p2 = scmp.eq.s32.totalorder %s1071_s21, 1  ;;  %p145_p3 = scmp.ne.s32.totalorder %s1347_s16, %s1343_s15 }
   0x8   : > { %s1847_s23 = smov (%p31_p0, %s29_s23), 0  ;;  %p146_p5 = scmp.eq.s32.totalorder %s1072_s22, 1 }
   0x9   : > { %p1433_p4 = por %p140_p2, %p139_p1  ;;  %s124_s26 = ssub.s32 %s1359_s19, %s1847_s23 }
   0xa   : > { %p1075_p6 = scmp.ge.s32.totalorder %s1363_s20, 1  ;;  %p127_p7 = scmp.eq.s32.totalorder %s124_s26, 0 }
   0xb   : > { %p1440_p8 = por %p146_p5, %p145_p3  ;;  %p187_p9 = scmp.lt.s32.totalorder %s1363_s20, 3 }
   0xc   : > { %s1446_s28 = scalar_select %p127_p7, %s1351_s17, %s129_s24  }
   0xd   : > { %p188_p10 = pnand %p1075_p6, %p187_p9 }
   0xe   : > { %p219_p11 = scmp.lt.s32.totalorder (!%p188_p10), %s1355_s18, 1  ;;  %s215_s12 = sand.u32 (!%p188_p10), 1, %s1347_s16  }
   0xf   : > { %191 = sbr.rel (%p188_p10) target bundleno = 318 (0x13e), region = 36  ;;  %s1076_s13 = sshll.u32 (!%p188_p10), %s215_s12, 6 }
  0x10   : > { %s1768_s14 = scalar_lea.vmem (!%p188_p10), [#allocation2], %s1076_s13  ;;  %s1117_s21 = sshll.u32 (!%p188_p10), %s1355_s18, 10 }
  0x11   : > { %s989_s22 = sshll.u32 (!%p188_p10), %s1768_s14, 4  ;;  %s1789_s30 = scalar_lea.sflag (!%p188_p10), [#allocation3], %s215_s12  ;;  %s1784_s22 = int_to_ptr.vmem [resolvable:$true] %s989_s22 }
  0x12   : > { %s1365_s5 = smov (!%p188_p10), [#allocation2]  }
  0x13   : > { %s1291_s6 = sshll.u32 (!%p188_p10), %s1365_s5, 4  ;;  %s1292_s6 = int_to_ptr.vmem [resolvable:$false] %s1291_s6 }
  0x14   : > { %v1255_v0 = vld [vmem:[%s1835_s1 + $0x78] sm:$0xff]   ;;  %v1259_v4 = vld [vmem:[%s1835_s1 + $0x70] sm:$0xff]   ;;  %v1263_v8 = vld [vmem:[%s1835_s1 + $0x68] sm:$0xff]   ;;  %v297_v21 = vlaneseq  ;;  %s220_s24 = scalar_select %p219_p11, %s1355_s18, 1 }
  0x15   : > { %v1256_v1 = vld [vmem:[%s1835_s1 + $0xf8] sm:$0xff]   ;;  %1118 = vmatprep.subr.bf16.mxu0 %v1255_v0  ;;  %v1260_v5 = vld [vmem:[%s1835_s1 + $0xf0] sm:$0xff]   ;;  %v1264_v9 = vld [vmem:[%s1835_s1 + $0xe8] sm:$0xff]   ;;  %s1287_s18 = scalar_lea.vmem %s1784_s22, 1024  ;;  %s1293_s7 = scalar_lea.vmem %s1292_s6, 2048 }
  0x16   : > { %v1257_v2 = vld [vmem:[%s1835_s1 + $0x38] sm:$0xff]   ;;  %1158 = vmatprep.subr.bf16.mxu1 %v1256_v1  ;;  %v1261_v6 = vld [vmem:[%s1835_s1 + $0x30] sm:$0xff]   ;;  %v1265_v10 = vld [vmem:[%s1835_s1 + $0x28] sm:$0xff]   ;;  %v298_v26 = vshrl.u32 %v297_v21, 7  ;;  %s1116_s10 = sshll.u32 %s220_s24, 9  ;;  %p1288_p12 = scmp.ne.s32.totalorder %s1784_s22, %s1287_s18 }
  0x17   : > { %v1258_v3 = vld [vmem:[%s1835_s1 + $0xb8] sm:$0xff]   ;;  %1119 = vmatpush3.bf16.msra.mxu0 %v1257_v2  ;;  %v1262_v7 = vld [vmem:[%s1835_s1 + $0xb0] sm:$0xff]   ;;  %v1266_v11 = vld [vmem:[%s1835_s1 + $0xa8] sm:$0xff]   ;;  %s1543_s24 = scalar_lea.vmem %s1834_s0, %s1116_s10  ;;  %p1294_p1 = scmp.lt.s32.totalorder %s1784_s22, %s1292_s6 }
  0x18   : > { %1159 = vmatpush3.bf16.msra.mxu1 %v1258_v3  ;;  %1120 = vmatprep.subr.bf16.mxu0 %v1259_v4  ;;  %v1267_v12 = vld [vmem:[%s1835_s1 + $0x60] sm:$0xff]   ;;  %v1271_v16 = vld [vmem:[%s1835_s1 + $0x58] sm:$0xff]   ;;  %v1275_v20 = vld [vmem:[%s1835_s1 + $0x50] sm:$0xff]   ;;  %v303_v31 = vsub.s32 1, %v298_v26  ;;  %v311_v33 = vsub.s32 3, %v298_v26  ;;  %v299_v35 = vsub.s32 0, %v298_v26  ;;  %p1289_p13 = pnand %p1288_p12, %p1433_p4  ;;  %p1295_p2 = scmp.lt.s32.totalorder %s1293_s7, %s1287_s18 }
  0x19   : > { %1160 = vmatprep.subr.bf16.mxu1 %v1260_v5  ;;  %v1268_v13 = vld [vmem:[%s1835_s1 + $0xe0] sm:$0xff]   ;;  %v1272_v17 = vld [vmem:[%s1835_s1 + $0xd8] sm:$0xff]   ;;  %v1276_v22 = vld [vmem:[%s1835_s1 + $0xd0] sm:$0xff]   ;;  %v307_v37 = vsub.s32 2, %v298_v26 }
  0x1a   : > { %v1269_v14 = vld [vmem:[%s1835_s1 + $0x20] sm:$0xff]   ;;  %v1273_v18 = vld [vmem:[%s1835_s1 + $0x18] sm:$0xff]   ;;  %v1277_v23 = vld [vmem:[%s1835_s1 + $0x10] sm:$0xff]   ;;  %p1290_p0 = pneg %p1289_p13  ;;  %p1296_p3 = por %p1295_p2, %p1294_p1 }
  0x1b   : > { %1121 = vmatpush3.bf16.msra.mxu0 %v1261_v6  ;;  %v1270_v15 = vld [vmem:[%s1835_s1 + $0xa0] sm:$0xff]   ;;  %v1274_v19 = vld [vmem:[%s1835_s1 + $0x98] sm:$0xff]   ;;  %v1278_v24 = vld [vmem:[%s1835_s1 + $0x90] sm:$0xff]  }
  0x1c   : > { %1161 = vmatpush3.bf16.msra.mxu1 %v1262_v7  ;;  %1122 = vmatprep.subr.bf16.mxu0 %v1263_v8  ;;  %v1279_v25 = vld [vmem:[%s1835_s1 + $0x48] sm:$0xff]   ;;  %v1283_v30 = vld [vmem:[%s1835_s1 + $0x40] sm:$0xff]   ;;  %v234_v46 = vld [vmem:[%s1543_s24 + $0x18] sm:$0xff]  ;;  %p1297_p5 = pnand %p1296_p3, %p1290_p0 }
  0x1d   : > { %1162 = vmatprep.subr.bf16.mxu1 %v1264_v9  ;;  %v1280_v27 = vld [vmem:[%s1835_s1 + $0xc8] sm:$0xff]   ;;  %v1284_v32 = vld [vmem:[%s1835_s1 + $0xc0] sm:$0xff]   ;;  %v238_v47 = vld [vmem:[%s1543_s24 + $0x38] sm:$0xff] }
  0x1e   : > { %v1281_v28 = vld [vmem:[%s1835_s1 + $0x8] sm:$0xff]   ;;  %v1285_v34 = vld [vmem:[%s1835_s1] sm:$0xff]   ;;  %v242_v48 = vld [vmem:[%s1543_s24 + $0x58] sm:$0xff] }
  0x1f   : > { %1123 = vmatpush3.bf16.msra.mxu0 %v1265_v10  ;;  %v1282_v29 = vld [vmem:[%s1835_s1 + $0x88] sm:$0xff]   ;;  %v1286_v36 = vld [vmem:[%s1835_s1 + $0x80] sm:$0xff]   ;;  %v246_v51 = vld [vmem:[%s1543_s24 + $0x78] sm:$0xff] }
  0x20   : > { %1163 = vmatpush3.bf16.msra.mxu1 %v1266_v11  ;;  %1124 = vmatprep.subr.bf16.mxu0 %v1267_v12  ;;  %v232_v38 = vld [vmem:[%s1543_s24 + $0x8] sm:$0xff]  ;;  %v295_v42 = vld [vmem:[%s1836_s2] sm:$0xf] }
  0x21   : > { %1164 = vmatprep.subr.bf16.mxu1 %v1268_v13  ;;  %v236_v39 = vld [vmem:[%s1543_s24 + $0x28] sm:$0xff]  ;;  %v381_v43 = vld [vmem:[%s1837_s3] sm:$0xf]  ;;  %v1561_v44 = vrot.slane %v295_v42, %v303_v31  ;;  %v1568_v49 = vrot.slane %v295_v42, %v311_v33  ;;  %v1573_v52 = vrot.slane %v295_v42, %v299_v35  ;;  %v1577_v54 = vrot.slane %v295_v42, %v307_v37 }
  0x22   : > { %v240_v40 = vld [vmem:[%s1543_s24 + $0x48] sm:$0xff]  ;;  %v1563_v45 = vrot.slane %v381_v43, %v303_v31  ;;  %v1570_v50 = vrot.slane %v381_v43, %v311_v33  ;;  %v1575_v53 = vrot.slane %v381_v43, %v299_v35  ;;  %v1579_v55 = vrot.slane %v381_v43, %v307_v37  ;;  %v231_v8 = vld [vmem:[%s1543_s24] sm:$0xff]  ;;  %v245_v31 = vld [vmem:[%s1543_s24 + $0x70] sm:$0xff] }
  0x23   : > { %1125 = vmatpush3.bf16.msra.mxu0 %v1269_v14  ;;  %v244_v41 = vld [vmem:[%s1543_s24 + $0x68] sm:$0xff]  ;;  %v318_v56 = vmul.f32 %v1561_v44, %v232_v38  ;;  %v322_v57 = vmul.f32 %v1561_v44, %v236_v39  ;;  %v326_v58 = vmul.f32 %v1561_v44, %v240_v40  ;;  %v320_v60 = vmul.f32 %v1568_v49, %v234_v46  ;;  %v235_v9 = vld [vmem:[%s1543_s24 + $0x20] sm:$0xff] }
  0x24   : > { %1165 = vmatpush3.bf16.msra.mxu1 %v1270_v15  ;;  %1126 = vmatprep.subr.bf16.mxu0 %v1271_v16  ;;  %v330_v59 = vmul.f32 %v1561_v44, %v244_v41  ;;  %v324_v61 = vmul.f32 %v1568_v49, %v238_v47  ;;  %v328_v62 = vmul.f32 %v1568_v49, %v242_v48  ;;  %v239_v14 = vld [vmem:[%s1543_s24 + $0x40] sm:$0xff]  ;;  %v248_v40 = vld [vmem:[%s1543_s24 + $0x88] sm:$0xff] }
  0x25   : > { %1166 = vmatprep.subr.bf16.mxu1 %v1272_v17  ;;  %v332_v63 = vmul.f32 %v1568_v49, %v246_v51  ;;  %v404_v0 = vadd.f32 %v1563_v45, %v318_v56  ;;  %v408_v1 = vadd.f32 %v1563_v45, %v322_v57  ;;  %v412_v2 = vadd.f32 %v1563_v45, %v326_v58  ;;  %v243_v15 = vld [vmem:[%s1543_s24 + $0x60] sm:$0xff]  ;;  %v252_v47 = vld [vmem:[%s1543_s24 + $0xa8] sm:$0xff] }
  0x26   : > { %v416_v3 = vadd.f32 %v1563_v45, %v330_v59  ;;  %v406_v4 = vadd.f32 %v1570_v50, %v320_v60  ;;  %v410_v5 = vadd.f32 %v1570_v50, %v324_v61  ;;  %v414_v6 = vadd.f32 %v1570_v50, %v328_v62  ;;  %v256_v58 = vld [vmem:[%s1543_s24 + $0xc8] sm:$0xff] }
  0x27   : > { %1127 = vmatpush3.bf16.msra.mxu0 %v1273_v18  ;;  %v418_v7 = vadd.f32 %v1570_v50, %v332_v63  ;;  %v468_v10 = vmax.f32 %v404_v0, 0.0  ;;  %v472_v11 = vmax.f32 %v408_v1, 0.0  ;;  %v476_v12 = vmax.f32 %v412_v2, 0.0  ;;  %v260_v59 = vld [vmem:[%s1543_s24 + $0xe8] sm:$0xff] }
  0x28   : > { %1167 = vmatpush3.bf16.msra.mxu1 %v1274_v19  ;;  %1128 = vmatprep.subr.bf16.mxu0 %v1275_v20  ;;  %v480_v13 = vmax.f32 %v416_v3, 0.0  ;;  %v470_v16 = vmax.f32 %v406_v4, 0.0  ;;  %v474_v17 = vmax.f32 %v410_v5, 0.0  ;;  %v478_v18 = vmax.f32 %v414_v6, 0.0  ;;  %v233_v20 = vld [vmem:[%s1543_s24 + $0x10] sm:$0xff]  ;;  %v250_v4 = vld [vmem:[%s1543_s24 + $0x98] sm:$0xff] }
  0x29   : > { %1168 = vmatprep.subr.bf16.mxu1 %v1276_v22  ;;  %v482_v19 = vmax.f32 %v418_v7, 0.0  ;;  %v532_v21 = vadd.f32 %v472_v11, %v468_v10  ;;  %v319_v35 = vmul.f32 %v1577_v54, %v233_v20  ;;  %v331_v46 = vmul.f32 %v1577_v54, %v245_v31  ;;  %v258_v10 = vld [vmem:[%s1543_s24 + $0xd8] sm:$0xff] }
  0x2a   : > { %v536_v22 = vadd.f32 %v480_v13, %v476_v12  ;;  %v534_v26 = vadd.f32 %v474_v17, %v470_v16  ;;  %v334_v63 = vmul.f32 %v1561_v44, %v248_v40  ;;  %v338_v3 = vmul.f32 %v1561_v44, %v252_v47  ;;  %v249_v40 = vld [vmem:[%s1543_s24 + $0x90] sm:$0xff] }
  0x2b   : > { %1129 = vmatpush3.bf16.msra.mxu0 %v1277_v23  ;;  %v317_v23 = vmul.f32 %v1573_v52, %v231_v8  ;;  %v405_v56 = vadd.f32 %v1579_v55, %v319_v35  ;;  %v417_v62 = vadd.f32 %v1579_v55, %v331_v46  ;;  %v342_v7 = vmul.f32 %v1561_v44, %v256_v58  ;;  %v259_v35 = vld [vmem:[%s1543_s24 + $0xe0] sm:$0xff]  ;;  %v253_v47 = vld [vmem:[%s1543_s24 + $0xb0] sm:$0xff] }
  0x2c   : > { %1169 = vmatpush3.bf16.msra.mxu1 %v1278_v24  ;;  %1130 = vmatprep.subr.bf16.mxu0 %v1279_v25  ;;  %v321_v24 = vmul.f32 %v1573_v52, %v235_v9  ;;  %v237_v25 = vld [vmem:[%s1543_s24 + $0x30] sm:$0xff]  ;;  %v346_v8 = vmul.f32 %v1561_v44, %v260_v59  ;;  %v254_v9 = vld [vmem:[%s1543_s24 + $0xb8] sm:$0xff]  ;;  %v420_v13 = vadd.f32 %v1563_v45, %v334_v63 }
  0x2d   : > { %1170 = vmatprep.subr.bf16.mxu1 %v1280_v27  ;;  %v538_v27 = vadd.f32 %v482_v19, %v478_v18  ;;  %v403_v33 = vadd.f32 %v1575_v53, %v317_v23  ;;  %v323_v39 = vmul.f32 %v1577_v54, %v237_v25  ;;  %v469_v1 = vmax.f32 %v405_v56, 0.0  ;;  %v251_v25 = vld [vmem:[%s1543_s24 + $0xa0] sm:$0xff]  ;;  %v257_v58 = vld [vmem:[%s1543_s24 + $0xd0] sm:$0xff] }
  0x2e   : > { %v481_v6 = vmax.f32 %v417_v62, 0.0  ;;  %v428_v17 = vadd.f32 %v1563_v45, %v342_v7  ;;  %v432_v18 = vadd.f32 %v1563_v45, %v346_v8  ;;  %v336_v19 = vmul.f32 %v1568_v49, %v250_v4  ;;  %v261_v59 = vld [vmem:[%s1543_s24 + $0xf0] sm:$0xff]  ;;  %v264_v4 = vld [vmem:[%s1543_s24 + $0x108] sm:$0xff] }
  0x2f   : > { %1131 = vmatpush3.bf16.msra.mxu0 %v1281_v28  ;;  %v325_v28 = vmul.f32 %v1573_v52, %v239_v14  ;;  %v467_v41 = vmax.f32 %v403_v33, 0.0  ;;  %v409_v57 = vadd.f32 %v1579_v55, %v323_v39  ;;  %v424_v14 = vadd.f32 %v1563_v45, %v338_v3 }
  0x30   : > { %1171 = vmatpush3.bf16.msra.mxu1 %v1282_v29  ;;  %1132 = vmatprep.subr.bf16.mxu0 %v1283_v30  ;;  %v329_v29 = vmul.f32 %v1573_v52, %v243_v15  ;;  %v241_v30 = vld [vmem:[%s1543_s24 + $0x50] sm:$0xff]  ;;  %v262_v15 = vld [vmem:[%s1543_s24 + $0xf8] sm:$0xff]  ;;  %v484_v20 = vmax.f32 %v420_v13, 0.0  ;;  %v344_v23 = vmul.f32 %v1568_v49, %v258_v10  ;;  %v337_v39 = vmul.f32 %v1573_v52, %v251_v25 }
  0x31   : > { %1172 = vmatprep.subr.bf16.mxu1 %v1284_v32  ;;  %v564_v32 = vpack.c.bf16 %v536_v22, %v532_v21  ;;  %v411_v37 = vadd.f32 %v1575_v53, %v325_v28  ;;  %v327_v43 = vmul.f32 %v1577_v54, %v241_v30  ;;  %v473_v2 = vmax.f32 %v409_v57, 0.0  ;;  %v255_v30 = vld [vmem:[%s1543_s24 + $0xc0] sm:$0xff] }
  0x32   : > { %v415_v38 = vadd.f32 %v1575_v53, %v329_v29  ;;  %v488_v21 = vmax.f32 %v424_v14, 0.0  ;;  %v340_v22 = vmul.f32 %v1568_v49, %v254_v9  ;;  %v496_v28 = vmax.f32 %v432_v18, 0.0  ;;  %v268_v9 = vld [vmem:[%s1543_s24 + $0x128] sm:$0xff] }
  0x33   : > { %1133 = vmatpush3.bf16.msra.mxu0 %v1285_v34  ;;  %v407_v34 = vadd.f32 %v1575_v53, %v321_v24  ;;  %867 = vmatprep.mubr.bf16.mxu0 %v564_v32  ;;  %v475_v48 = vmax.f32 %v411_v37, 0.0  ;;  %v413_v61 = vadd.f32 %v1579_v55, %v327_v43  ;;  %v533_v12 = vadd.f32 %v473_v2, %v469_v1  ;;  %v247_v24 = vld [vmem:[%s1543_s24 + $0x80] sm:$0xff]  ;;  %v272_v14 = vld [vmem:[%s1543_s24 + $0x148] sm:$0xff] }
  0x34   : > { %1173 = vmatpush3.bf16.msra.mxu1 %v1286_v36  ;;  %v566_v36 = vpack.c.bf16 %v538_v27, %v534_v26  ;;  %v479_v51 = vmax.f32 %v415_v38, 0.0  ;;  %v492_v27 = vmax.f32 %v428_v17, 0.0  ;;  %v348_v29 = vmul.f32 %v1568_v49, %v262_v15  ;;  %v276_v15 = vld [vmem:[%s1543_s24 + $0x168] sm:$0xff] }
  0x35   : > { %v471_v42 = vmax.f32 %v407_v34, 0.0  ;;  %v477_v5 = vmax.f32 %v413_v61, 0.0  ;;  %v540_v31 = vadd.f32 %v488_v21, %v484_v20  ;;  %v422_v32 = vadd.f32 %v1570_v50, %v336_v19 }
  0x36   : > { %932 = vmatprep.mubr.bf16.mxu1 %v566_v36  ;;  %v535_v0 = vadd.f32 %v479_v51, %v475_v48  ;;  %v426_v33 = vadd.f32 %v1570_v50, %v340_v22  ;;  %v430_v34 = vadd.f32 %v1570_v50, %v344_v23  ;;  %v544_v36 = vadd.f32 %v496_v28, %v492_v27 }
  0x37   : > { %v531_v60 = vadd.f32 %v471_v42, %v467_v41  ;;  %v537_v16 = vadd.f32 %v481_v6, %v477_v5  ;;  %v434_v37 = vadd.f32 %v1570_v50, %v348_v29  ;;  %v333_v38 = vmul.f32 %v1573_v52, %v247_v24  ;;  %v266_v24 = vld [vmem:[%s1543_s24 + $0x118] sm:$0xff] }
  0x38   : > { %v486_v41 = vmax.f32 %v422_v32, 0.0  ;;  %v490_v42 = vmax.f32 %v426_v33, 0.0  ;;  %v494_v43 = vmax.f32 %v430_v34, 0.0  ;;  %v341_v46 = vmul.f32 %v1573_v52, %v255_v30  ;;  %v270_v29 = vld [vmem:[%s1543_s24 + $0x138] sm:$0xff] }
  0x39   : > { %v563_v11 = vpack.c.bf16 %v535_v0, %v531_v60  ;;  %v565_v26 = vpack.c.bf16 %v537_v16, %v533_v12  ;;  %v568_v48 = vpack.c.bf16 %v544_v36, %v540_v31  ;;  %v498_v51 = vmax.f32 %v434_v37, 0.0  ;;  %v274_v30 = vld [vmem:[%s1543_s24 + $0x158] sm:$0xff] }
  0x3a   : > { %v345_v56 = vmul.f32 %v1573_v52, %v259_v35  ;;  %v419_v57 = vadd.f32 %v1575_v53, %v333_v38  ;;  %v542_v60 = vadd.f32 %v490_v42, %v486_v41  ;;  %v423_v61 = vadd.f32 %v1575_v53, %v337_v39  ;;  %v278_v35 = vld [vmem:[%s1543_s24 + $0x178] sm:$0xff] }
  0x3b   : > { %868 = vmatmul.mubr.bf16.vlgmr.msra.gmra.mxu0 %v563_v11  ;;  %933 = vmatmul.mubr.bf16.vlgmr.msra.gmra.mxu1 %v565_v26  ;;  %v427_v62 = vadd.f32 %v1575_v53, %v341_v46  ;;  %v335_v63 = vmul.f32 %v1577_v54, %v249_v40  ;;  %v546_v0 = vadd.f32 %v498_v51, %v494_v43  ;;  %v263_v46 = vld [vmem:[%s1543_s24 + $0x100] sm:$0xff] }
  0x3c   : > { %875 = vmatprep.mubr.bf16.mxu0 %v568_v48  ;;  %v431_v1 = vadd.f32 %v1575_v53, %v345_v56  ;;  %v483_v2 = vmax.f32 %v419_v57, 0.0  ;;  %v339_v3 = vmul.f32 %v1577_v54, %v253_v47  ;;  %v487_v5 = vmax.f32 %v423_v61, 0.0  ;;  %v267_v47 = vld [vmem:[%s1543_s24 + $0x120] sm:$0xff] }
  0x3d   : > { %v491_v6 = vmax.f32 %v427_v62, 0.0  ;;  %v343_v7 = vmul.f32 %v1577_v54, %v257_v58  ;;  %v347_v8 = vmul.f32 %v1577_v54, %v261_v59  ;;  %v570_v10 = vpack.c.bf16 %v546_v0, %v542_v60  ;;  %v271_v58 = vld [vmem:[%s1543_s24 + $0x140] sm:$0xff] }
  0x3e   : > { %v495_v11 = vmax.f32 %v431_v1, 0.0  ;;  %v421_v12 = vadd.f32 %v1579_v55, %v335_v63  ;;  %v425_v13 = vadd.f32 %v1579_v55, %v339_v3  ;;  %v539_v16 = vadd.f32 %v487_v5, %v483_v2  ;;  %v275_v63 = vld [vmem:[%s1543_s24 + $0x160] sm:$0xff] }
  0x3f   : > { %v429_v17 = vadd.f32 %v1579_v55, %v343_v7  ;;  %v433_v18 = vadd.f32 %v1579_v55, %v347_v8  ;;  %v350_v19 = vmul.f32 %v1561_v44, %v264_v4  ;;  %940 = vmatprep.mubr.bf16.mxu1 %v570_v10  ;;  %v354_v23 = vmul.f32 %v1561_v44, %v268_v9  ;;  %v265_v4 = vld [vmem:[%s1543_s24 + $0x110] sm:$0xff] }
  0x40   : > { %v543_v20 = vadd.f32 %v495_v11, %v491_v6  ;;  %v485_v21 = vmax.f32 %v421_v12, 0.0  ;;  %v489_v22 = vmax.f32 %v425_v13, 0.0  ;;  %v358_v27 = vmul.f32 %v1561_v44, %v272_v14  ;;  %v269_v9 = vld [vmem:[%s1543_s24 + $0x130] sm:$0xff] }
  0x41   : > { %v493_v25 = vmax.f32 %v429_v17, 0.0  ;;  %v497_v26 = vmax.f32 %v433_v18, 0.0  ;;  %v362_v28 = vmul.f32 %v1561_v44, %v276_v15  ;;  %v436_v33 = vadd.f32 %v1563_v45, %v350_v19  ;;  %v273_v14 = vld [vmem:[%s1543_s24 + $0x150] sm:$0xff] }
  0x42   : > { %v567_v31 = vpack.c.bf16 %v543_v20, %v539_v16  ;;  %v541_v32 = vadd.f32 %v489_v22, %v485_v21  ;;  %v440_v34 = vadd.f32 %v1563_v45, %v354_v23  ;;  %v444_v37 = vadd.f32 %v1563_v45, %v358_v27  ;;  %v277_v15 = vld [vmem:[%s1543_s24 + $0x170] sm:$0xff] }
  0x43   : > { %v545_v36 = vadd.f32 %v497_v26, %v493_v25  ;;  %v448_v38 = vadd.f32 %v1563_v45, %v362_v28  ;;  %v352_v39 = vmul.f32 %v1568_v49, %v266_v24  ;;  %v500_v40 = vmax.f32 %v436_v33, 0.0  ;;  %v280_v24 = vld [vmem:[%s1543_s24 + $0x188] sm:$0xff] }
  0x44   : > { %876 = vmatmul.mubr.bf16.gmra.mxu0 %v567_v31  ;;  %v504_v41 = vmax.f32 %v440_v34, 0.0  ;;  %v356_v42 = vmul.f32 %v1568_v49, %v270_v29  ;;  %v360_v43 = vmul.f32 %v1568_v49, %v274_v30  ;;  %v508_v51 = vmax.f32 %v444_v37, 0.0  ;;  %v284_v29 = vld [vmem:[%s1543_s24 + $0x1a8] sm:$0xff] }
  0x45   : > { %v569_v48 = vpack.c.bf16 %v545_v36, %v541_v32  ;;  %v512_v56 = vmax.f32 %v448_v38, 0.0  ;;  %v364_v57 = vmul.f32 %v1568_v49, %v278_v35  ;;  %v438_v60 = vadd.f32 %v1570_v50, %v352_v39  ;;  %v288_v34 = vld [vmem:[%s1543_s24 + $0x1c8] sm:$0xff] }
  0x46   : > { %v548_v59 = vadd.f32 %v504_v41, %v500_v40  ;;  %v442_v61 = vadd.f32 %v1570_v50, %v356_v42  ;;  %v446_v62 = vadd.f32 %v1570_v50, %v360_v43  ;;  %v349_v2 = vmul.f32 %v1573_v52, %v263_v46  ;;  %v292_v35 = vld [vmem:[%s1543_s24 + $0x1e8] sm:$0xff]  ;;  %v282_v46 = vld [vmem:[%s1543_s24 + $0x198] sm:$0xff] }
  0x47   : > { %941 = vmatmul.mubr.bf16.gmra.mxu1 %v569_v48  ;;  %v552_v0 = vadd.f32 %v512_v56, %v508_v51  ;;  %v450_v1 = vadd.f32 %v1570_v50, %v364_v57  ;;  %v353_v3 = vmul.f32 %v1573_v52, %v267_v47  ;;  %v502_v5 = vmax.f32 %v438_v60, 0.0  ;;  %v286_v57 = vld [vmem:[%s1543_s24 + $0x1b8] sm:$0xff] }
  0x48   : > { %v506_v6 = vmax.f32 %v442_v61, 0.0  ;;  %v510_v7 = vmax.f32 %v446_v62, 0.0  ;;  %v357_v8 = vmul.f32 %v1573_v52, %v271_v58  ;;  %v361_v12 = vmul.f32 %v1573_v52, %v275_v63  ;;  %v290_v58 = vld [vmem:[%s1543_s24 + $0x1d8] sm:$0xff] }
  0x49   : > { %v572_v10 = vpack.c.bf16 %v552_v0, %v548_v59  ;;  %v514_v11 = vmax.f32 %v450_v1, 0.0  ;;  %v435_v13 = vadd.f32 %v1575_v53, %v349_v2  ;;  %v439_v17 = vadd.f32 %v1575_v53, %v353_v3  ;;  %v294_v63 = vld [vmem:[%s1543_s24 + $0x1f8] sm:$0xff] }
  0x4a   : > { %v550_v16 = vadd.f32 %v506_v6, %v502_v5  ;;  %v443_v18 = vadd.f32 %v1575_v53, %v357_v8  ;;  %v351_v19 = vmul.f32 %v1577_v54, %v265_v4  ;;  %v447_v21 = vadd.f32 %v1575_v53, %v361_v12  ;;  %v283_v8 = vld [vmem:[%s1543_s24 + $0x1a0] sm:$0xff] }
  0x4b   : > { %883 = vmatprep.mubr.bf16.mxu0 %v572_v10  ;;  %v554_v20 = vadd.f32 %v514_v11, %v510_v7  ;;  %v499_v22 = vmax.f32 %v435_v13, 0.0  ;;  %v355_v23 = vmul.f32 %v1577_v54, %v269_v9  ;;  %v503_v25 = vmax.f32 %v439_v17, 0.0  ;;  %v279_v7 = vld [vmem:[%s1543_s24 + $0x180] sm:$0xff] }
  0x4c   : > { %v507_v26 = vmax.f32 %v443_v18, 0.0  ;;  %v359_v27 = vmul.f32 %v1577_v54, %v273_v14  ;;  %v363_v28 = vmul.f32 %v1577_v54, %v277_v15  ;;  %v511_v31 = vmax.f32 %v447_v21, 0.0  ;;  %v287_v13 = vld [vmem:[%s1543_s24 + $0x1c0] sm:$0xff]  ;;  %v281_v21 = vld [vmem:[%s1543_s24 + $0x190] sm:$0xff] }
  0x4d   : > { %v574_v30 = vpack.c.bf16 %v554_v20, %v550_v16  ;;  %v437_v32 = vadd.f32 %v1579_v55, %v351_v19  ;;  %v441_v33 = vadd.f32 %v1579_v55, %v355_v23  ;;  %v547_v36 = vadd.f32 %v503_v25, %v499_v22  ;;  %v291_v17 = vld [vmem:[%s1543_s24 + $0x1e0] sm:$0xff] }
  0x4e   : > { %v445_v37 = vadd.f32 %v1579_v55, %v359_v27  ;;  %v449_v38 = vadd.f32 %v1579_v55, %v363_v28  ;;  %v366_v39 = vmul.f32 %v1561_v44, %v280_v24  ;;  %v551_v40 = vadd.f32 %v511_v31, %v507_v26  ;;  %v285_v26 = vld [vmem:[%s1543_s24 + $0x1b0] sm:$0xff] }
  0x4f   : > { %948 = vmatprep.mubr.bf16.mxu1 %v574_v30  ;;  %v501_v41 = vmax.f32 %v437_v32, 0.0  ;;  %v505_v42 = vmax.f32 %v441_v33, 0.0  ;;  %v370_v43 = vmul.f32 %v1561_v44, %v284_v29  ;;  %v374_v51 = vmul.f32 %v1561_v44, %v288_v34  ;;  %v289_v31 = vld [vmem:[%s1543_s24 + $0x1d0] sm:$0xff] }
  0x50   : > { %v509_v47 = vmax.f32 %v445_v37, 0.0  ;;  %v513_v48 = vmax.f32 %v449_v38, 0.0  ;;  %v378_v56 = vmul.f32 %v1561_v44, %v292_v35  ;;  %v571_v59 = vpack.c.bf16 %v551_v40, %v547_v36  ;;  %v293_v32 = vld [vmem:[%s1543_s24 + $0x1f0] sm:$0xff]  ;;  %s1782_s24 = scalar_lea.hbm %s1838_s4, %s1117_s21 }
  0x51   : > { %v549_v60 = vadd.f32 %v505_v42, %v501_v41  ;;  %v452_v61 = vadd.f32 %v1563_v45, %v366_v39  ;;  %v456_v62 = vadd.f32 %v1563_v45, %v370_v43  ;;  %v460_v1 = vadd.f32 %v1563_v45, %v374_v51 }
  0x52   : > { %v553_v0 = vadd.f32 %v513_v48, %v509_v47  ;;  %v464_v2 = vadd.f32 %v1563_v45, %v378_v56  ;;  %v368_v3 = vmul.f32 %v1568_v49, %v282_v46  ;;  %884 = vmatmul.mubr.bf16.gmra.mxu0 %v571_v59  ;;  %v372_v5 = vmul.f32 %v1568_v49, %v286_v57 }
  0x53   : > { %v516_v44 = vmax.f32 %v452_v61, 0.0  ;;  %v520_v4 = vmax.f32 %v456_v62, 0.0  ;;  %v376_v6 = vmul.f32 %v1568_v49, %v290_v58  ;;  %v524_v10 = vmax.f32 %v460_v1, 0.0 }
  0x54   : > { %v573_v9 = vpack.c.bf16 %v553_v0, %v549_v60  ;;  %v528_v11 = vmax.f32 %v464_v2, 0.0  ;;  %v380_v12 = vmul.f32 %v1568_v49, %v294_v63  ;;  %v454_v14 = vadd.f32 %v1570_v50, %v368_v3 }
  0x55   : > { %v556_v45 = vadd.f32 %v520_v4, %v516_v44  ;;  %v458_v15 = vadd.f32 %v1570_v50, %v372_v5  ;;  %v462_v16 = vadd.f32 %v1570_v50, %v376_v6  ;;  %v365_v20 = vmul.f32 %v1573_v52, %v279_v7 }
  0x56   : > { %949 = vmatmul.mubr.bf16.gmra.mxu1 %v573_v9  ;;  %v560_v18 = vadd.f32 %v528_v11, %v524_v10  ;;  %v466_v19 = vadd.f32 %v1570_v50, %v380_v12  ;;  %v369_v49 = vmul.f32 %v1573_v52, %v283_v8  ;;  %v518_v22 = vmax.f32 %v454_v14, 0.0 }
  0x57   : > { %v522_v23 = vmax.f32 %v458_v15, 0.0  ;;  %v526_v24 = vmax.f32 %v462_v16, 0.0  ;;  %v373_v25 = vmul.f32 %v1573_v52, %v287_v13  ;;  %v377_v29 = vmul.f32 %v1573_v52, %v291_v17 }
  0x58   : > { %v576_v27 = vpack.c.bf16 %v560_v18, %v556_v45  ;;  %v530_v28 = vmax.f32 %v466_v19, 0.0  ;;  %v451_v30 = vadd.f32 %v1575_v53, %v365_v20  ;;  %v455_v33 = vadd.f32 %v1575_v53, %v369_v49 }
  0x59   : > { %v558_v50 = vadd.f32 %v522_v23, %v518_v22  ;;  %v459_v34 = vadd.f32 %v1575_v53, %v373_v25  ;;  %v367_v35 = vmul.f32 %v1577_v54, %v281_v21  ;;  %v463_v37 = vadd.f32 %v1575_v53, %v377_v29 }
  0x5a   : > { %891 = vmatprep.mubr.bf16.mxu0 %v576_v27  ;;  %v562_v36 = vadd.f32 %v530_v28, %v526_v24  ;;  %v515_v38 = vmax.f32 %v451_v30, 0.0  ;;  %v371_v39 = vmul.f32 %v1577_v54, %v285_v26  ;;  %v519_v40 = vmax.f32 %v455_v33, 0.0 }
  0x5b   : > { %v523_v52 = vmax.f32 %v459_v34, 0.0  ;;  %v375_v41 = vmul.f32 %v1577_v54, %v289_v31  ;;  %v379_v42 = vmul.f32 %v1577_v54, %v293_v32  ;;  %v527_v46 = vmax.f32 %v463_v37, 0.0 }
  0x5c   : > { %v578_v43 = vpack.c.bf16 %v562_v36, %v558_v50  ;;  %v453_v47 = vadd.f32 %v1579_v55, %v367_v35  ;;  %v457_v48 = vadd.f32 %v1579_v55, %v371_v39  ;;  %v555_v51 = vadd.f32 %v519_v40, %v515_v38 }
  0x5d   : > { %v461_v56 = vadd.f32 %v1579_v55, %v375_v41  ;;  %v465_v53 = vadd.f32 %v1579_v55, %v379_v42  ;;  %v559_v57 = vadd.f32 %v527_v46, %v523_v52 }
  0x5e   : > { %956 = vmatprep.mubr.bf16.mxu1 %v578_v43  ;;  %v517_v58 = vmax.f32 %v453_v47, 0.0  ;;  %v521_v59 = vmax.f32 %v457_v48, 0.0 }
  0x5f   : > { %v525_v60 = vmax.f32 %v461_v56, 0.0  ;;  %v529_v61 = vmax.f32 %v465_v53, 0.0  ;;  %v575_v54 = vpack.c.bf16 %v559_v57, %v555_v51 }
  0x60   : > { %v557_v62 = vadd.f32 %v521_v59, %v517_v58 }
  0x61   : > { %v561_v63 = vadd.f32 %v529_v61, %v525_v60  ;;  %892 = vmatmul.mubr.bf16.gmra.mxu0 %v575_v54 }
  0x63   : > { %v577_v0 = vpack.c.bf16 %v561_v63, %v557_v62 }
  0x65   : > { %957 = vmatmul.mubr.bf16.gmra.mxu1 %v577_v0 }
  0xfb   : > { %v1134_v1 = vpop.f32.mrf.mxu0  ;;  %v1174_v3 = vpop.f32.mrf.mxu1 }
  0xfd   : > { %v1135_v2 = vpop.f32.mrf.mxu0  ;;  %v1175_v4 = vpop.f32.mrf.mxu1 }
  0xfe   : > { %v1136_v44 = vadd.f32 %v1135_v2, %v1134_v1  ;;  %v1176_v5 = vadd.f32 %v1175_v4, %v1174_v3 }
  0xff   : > { %v1137_v55 = vpop.f32.mrf.mxu0  ;;  %v1177_v7 = vpop.f32.mrf.mxu1 }
 0x100   : > { %v935_v8 = vadd.f32 %v1176_v5, %v1136_v44 }
 0x101   : > { %v1138_v6 = vpop.f32.mrf.mxu0  ;;  %v1178_v10 = vpop.f32.mrf.mxu1 }
 0x102   : > { %v1139_v9 = vadd.f32 %v1138_v6, %v1137_v55  ;;  %965 = vst [vmem:[%s1768_s14] sm:$0xff] %v935_v8  ;;  %v1179_v11 = vadd.f32 %v1178_v10, %v1177_v7 }
 0x104   : > { %v938_v12 = vadd.f32 %v1179_v11, %v1139_v9  ;;  %v1140_v13 = vpop.f32.mrf.mxu0 }
 0x106   : > { %966 = vst [vmem:[%s1768_s14 + $0x8] sm:$0xff] %v938_v12  ;;  %v1141_v45 = vpop.f32.mrf.mxu0 }
 0x107   : > { %v1180_v14 = vpop.f32.mrf.mxu1  ;;  %v1142_v15 = vadd.f32 %v1141_v45, %v1140_v13 }
 0x108   : > { %v1143_v16 = vpop.f32.mrf.mxu0 }
 0x109   : > { %v1181_v17 = vpop.f32.mrf.mxu1 }
 0x10a   : > { %v1182_v18 = vadd.f32 %v1181_v17, %v1180_v14  ;;  %v1144_v19 = vpop.f32.mrf.mxu0 }
 0x10b   : > { %v1183_v20 = vpop.f32.mrf.mxu1  ;;  %v1145_v21 = vadd.f32 %v1144_v19, %v1143_v16 }
 0x10c   : > { %v943_v49 = vadd.f32 %v1182_v18, %v1142_v15 }
 0x10d   : > { %v1184_v22 = vpop.f32.mrf.mxu1 }
 0x10e   : > { %967 = vst [vmem:[%s1768_s14 + $0x10] sm:$0xff] %v943_v49  ;;  %v1185_v23 = vadd.f32 %v1184_v22, %v1183_v20 }
 0x110   : > { %v946_v24 = vadd.f32 %v1185_v23, %v1145_v21 }
 0x112   : > { %968 = vst [vmem:[%s1768_s14 + $0x18] sm:$0xff] %v946_v24  ;;  %v1146_v25 = vpop.f32.mrf.mxu0 }
 0x114   : > { %v1147_v26 = vpop.f32.mrf.mxu0 }
 0x115   : > { %v1148_v28 = vadd.f32 %v1147_v26, %v1146_v25 }
 0x116   : > { %v1186_v27 = vpop.f32.mrf.mxu1  ;;  %v1149_v29 = vpop.f32.mrf.mxu0 }
 0x118   : > { %v1187_v30 = vpop.f32.mrf.mxu1  ;;  %v1150_v32 = vpop.f32.mrf.mxu0 }
 0x119   : > { %v1188_v31 = vadd.f32 %v1187_v30, %v1186_v27  ;;  %v1151_v34 = vadd.f32 %v1150_v32, %v1149_v29 }
 0x11a   : > { %v1189_v50 = vpop.f32.mrf.mxu1 }
 0x11b   : > { %v951_v33 = vadd.f32 %v1188_v31, %v1148_v28 }
 0x11c   : > { %v1190_v35 = vpop.f32.mrf.mxu1 }
 0x11d   : > { %969 = vst [vmem:[%s1768_s14 + $0x20] sm:$0xff] %v951_v33  ;;  %v1191_v36 = vadd.f32 %v1190_v35, %v1189_v50 }
 0x11f   : > { %v954_v37 = vadd.f32 %v1191_v36, %v1151_v34 }
 0x121   : > { %970 = vst [vmem:[%s1768_s14 + $0x28] sm:$0xff] %v954_v37  ;;  %v1152_v38 = vpop.f32.mrf.mxu0 }
 0x123   : > { %v1153_v39 = vpop.f32.mrf.mxu0 }
 0x124   : > { %v1154_v52 = vadd.f32 %v1153_v39, %v1152_v38 }
 0x125   : > { %v1192_v40 = vpop.f32.mrf.mxu1  ;;  %v1155_v41 = vpop.f32.mrf.mxu0 }
 0x127   : > { %v1193_v42 = vpop.f32.mrf.mxu1  ;;  %v1156_v46 = vpop.f32.mrf.mxu0 }
 0x128   : > { %v1194_v43 = vadd.f32 %v1193_v42, %v1192_v40  ;;  %v1157_v51 = vadd.f32 %v1156_v46, %v1155_v41 }
 0x129   : > { %v1195_v47 = vpop.f32.mrf.mxu1 }
 0x12a   : > { %v959_v48 = vadd.f32 %v1194_v43, %v1154_v52 }
 0x12b   : > { %v1196_v56 = vpop.f32.mrf.mxu1 }
 0x12c   : > { %971 = vst [vmem:[%s1768_s14 + $0x30] sm:$0xff] %v959_v48  ;;  %v1197_v53 = vadd.f32 %v1196_v56, %v1195_v47 }
 0x12e   : > { %v962_v57 = vadd.f32 %v1197_v53, %v1157_v51 }
 0x130   : > { %972 = vst [vmem:[%s1768_s14 + $0x38] sm:$0xff] %v962_v57 }
 0x131   : > { %1300 = shalt.err (!%p1297_p5)
}
 0x132   : > { %s1301_s8 = scalar_lea.hbm %s1782_s24, 1024  ;;  %s1305_s11 = scalar_lea.hbm %s1838_s4, 2048 }
 0x133   : > { %p1302_p6 = scmp.ne.s32.totalorder %s1782_s24, %s1301_s8  ;;  %p1306_p10 = scmp.lt.s32.totalorder %s1782_s24, %s1838_s4 }
 0x134   : > { %p1307_p11 = scmp.lt.s32.totalorder %s1305_s11, %s1301_s8 }
 0x135   : > { %p1303_p7 = pnand %p1302_p6, %p1433_p4 }
 0x136   : > { %p1308_p12 = por %p1307_p11, %p1306_p10 }
 0x137   : > { %p1304_p9 = pneg %p1303_p7 }
 0x139   : > { %p1309_p13 = pnand %p1308_p12, %p1304_p9 }
 0x13b   : > { %1312 = shalt.err (!%p1309_p13)
}
 0x13c   : > { %s1366_s14 = smov 128   ;;  %s1367_s21 = smov 8  }
 0x13d   : > { %1198 = dma.vmem_to_hbm [thread:$0]  (%p1433_p4), %s1784_s22, 1024, %s1782_s24, %s1789_s30, %s1366_s14, %s1366_s14, %s1367_s21  }
 0x13e PF: > { %p1204_p0 = scmp.ge.s32.totalorder %s1363_s20, 2  ;;  %s1004_s26 = sand.u32 1, %s1343_s15  }
 0x13f   : > { %s1005_s29 = scalar_lea.sflag [#allocation3], %s1004_s26 }
 0x140   : > { %p1201_p1 = pnand %p1204_p0, %p1440_p8 }
 0x142   : > { %p1202_p2 = pneg %p1201_p1 }
 0x144   : > { %1338 = dma.done.wait (%p1202_p2), %s1005_s29, 1024  }
 0x145   : > { %1340 = vsyncadd (%p1202_p2), %s1005_s29, 4294966272  ;;  %s17_s20 = sadd.s32 1, %s1363_s20   ;;  %s1841_s15 = smov %s1347_s16 }
 0x146   : > { %p14_p3 = scmp.ge.s32.totalorder %s17_s20, 4   ;;  %s1842_s16 = smov %s1351_s17 }
 0x147   : > { %s1843_s17 = smov %s1446_s28  ;;  %s1844_s18 = smov %s1359_s19 }
 0x148   : > { %s1845_s19 = smov %s1847_s23  ;;  %16 = sbr.rel (!%p14_p3) target bundleno = 4 (0x4), region = 71 }
 0x14d   :  { %1010 = vsyncpa [#allocation3], 1 }
 0x14e   :  { %1012 = vsyncpa [#allocation3 + $0x1], 1 }

</bundles_post_ra>
